<compile_context>
chip_gen: v7x
topology: tpu7x:2x2x1
jax: 0.10.0
libtpu: 0.0.40
codegen_flags: <defaults>
</compile_context>

<pallas_src>
import functools

import jax
import jax.numpy as jnp
from jax.experimental import pallas as pl
from jax.experimental.pallas import tpu as pltpu


def yolo_kernel(x_ref, aux_ref, out_ref, scratch, *, stride, num_anchors):
    # x_ref:    (A, C5, GG)  raw head outputs for one batch element
    # aux_ref:  (A, 4,  GG)  rows: [grid_x, grid_y, anchor_w/stride, anchor_h/stride]
    # out_ref:  (A, GG, C5)  transformed predictions, box-major layout
    # scratch:  (A, C5, GG)  VMEM assembly buffer
    x = x_ref[...]

    # One whole-tile sigmoid: full (C5, GG) vregs through the EUP, single pass.
    sig = jax.nn.sigmoid(x)
    scratch[...] = sig

    # 4-row fixup (sublane-masked VMEM writes, cheap):
    #   rows 0,1: (sigmoid + grid offset) * stride
    #   rows 2,3: exp(raw) * scaled_anchor * stride   (exp restricted to 2 rows)
    scratch[:, 0:2, :] = (sig[:, 0:2, :] + aux_ref[:, 0:2, :]) * stride
    scratch[:, 2:4, :] = jnp.exp(x[:, 2:4, :]) * aux_ref[:, 2:4, :] * stride

    # Write back already transposed to (GG, C5) so the wrapper needs no XLA
    # transpose (would be a second full HBM pass). XLU is otherwise idle here.
    for a in range(num_anchors):  # A is small and static (e.g. 3)
        out_ref[a] = jnp.transpose(scratch[a])


def yolo_layer_forward(x, anchors, num_classes, img_dim=416):
    """Pallas implementation of YOLOLayer.forward.

    x: (B, num_anchors*(num_classes+5), G, G) float32, NCHW.
    returns: (B, num_anchors*G*G, num_classes+5) float32
             per box: [bx, by, bw, bh, obj, class_0 .. class_{C-1}]
    """
    B, C, G, G2 = x.shape
    assert G == G2
    A = len(anchors)
    C5 = num_classes + 5
    assert C == A * C5
    GG = G * G
    stride = img_dim / G

    # Pure reshape (no data movement): (B, A, C5, G*G).
    x_r = x.reshape(B, A, C5, GG).astype(jnp.float32)

    # Constant aux table (A, 4, GG): grid offsets + scaled anchors, built once.
    idx = jnp.arange(GG, dtype=jnp.int32)
    gx = (idx % G).astype(jnp.float32)            # column index j
    gy = (idx // G).astype(jnp.float32)           # row index i
    sa = jnp.asarray(anchors, dtype=jnp.float32) / jnp.float32(stride)  # (A, 2)
    aux = jnp.stack(
        [
            jnp.broadcast_to(gx, (A, GG)),
            jnp.broadcast_to(gy, (A, GG)),
            jnp.broadcast_to(sa[:, 0:1], (A, GG)),
            jnp.broadcast_to(sa[:, 1:2], (A, GG)),
        ],
        axis=1,
    )  # (A, 4, GG)

    kernel = functools.partial(
        yolo_kernel, stride=float(stride), num_anchors=A)

    elems = B * A * C5 * GG
    cost = pl.CostEstimate(
        flops=int(6 * elems),                       # rough: sigmoid poly + fixup
        transcendentals=int(elems + 2 * B * A * GG),  # whole-tile sigmoid + 2 exp rows
        bytes_accessed=int(4 * (2 * elems + A * 4 * GG)),
    )

    out = pl.pallas_call(
        kernel,
        out_shape=jax.ShapeDtypeStruct((B, A, GG, C5), jnp.float32),
        grid_spec=pltpu.PrefetchScalarGridSpec(
            num_scalar_prefetch=0,
            grid=(B,),
            in_specs=[
                pl.BlockSpec((None, A, C5, GG), lambda b: (b, 0, 0, 0)),
                pl.BlockSpec((A, 4, GG), lambda b: (0, 0, 0)),  # resident
            ],
            out_specs=pl.BlockSpec((None, A, GG, C5), lambda b: (b, 0, 0, 0)),
            scratch_shapes=[pltpu.VMEM((A, C5, GG), jnp.float32)],
        ),
        compiler_params=pltpu.CompilerParams(
            dimension_semantics=("parallel",)),
        cost_estimate=cost,
    )(x_r, aux)

    # (B, A, GG, C5) -> (B, A*GG, C5): pure reshape, no data movement.
    return out.reshape(B, A * GG, C5)


def yolo_layer_reference(x, anchors, num_classes, img_dim=416):
    """Pure-JAX reference mirroring the PyTorch code exactly."""
    B, C, G, _ = x.shape
    A = len(anchors)
    C5 = num_classes + 5
    stride = img_dim / G

    pred = x.reshape(B, A, C5, G, G).transpose(0, 1, 3, 4, 2)  # (B,A,G,G,C5)
    obj = jax.nn.sigmoid(pred[..., 4])
    cls = jax.nn.sigmoid(pred[..., 5:])

    grid_x = jnp.broadcast_to(jnp.arange(G, dtype=jnp.float32), (1, 1, G, G))
    grid_y = jnp.transpose(grid_x, (0, 1, 3, 2))
    sa = jnp.asarray(anchors, dtype=jnp.float32) / stride
    aw = sa[:, 0].reshape(1, A, 1, 1)
    ah = sa[:, 1].reshape(1, A, 1, 1)

    bx = jax.nn.sigmoid(pred[..., 0]) + grid_x
    by = jax.nn.sigmoid(pred[..., 1]) + grid_y
    bw = jnp.exp(pred[..., 2]) * aw
    bh = jnp.exp(pred[..., 3]) * ah
    boxes = jnp.stack([bx, by, bw, bh], axis=-1) * stride

    return jnp.concatenate(
        [boxes.reshape(B, -1, 4),
         obj.reshape(B, -1, 1),
         cls.reshape(B, -1, num_classes)], axis=-1)


if __name__ == "__main__":
    # Small, deterministic example consistent with the module:
    # num_anchors=3, num_classes=3 -> channels = 3*(3+5) = 24, grid = 16.
    anchors = [(10.0, 13.0), (16.0, 30.0), (33.0, 23.0)]
    num_classes = 3
    img_dim = 416
    B, G = 2, 16
    C = len(anchors) * (num_classes + 5)

    key = jax.random.PRNGKey(0)
    x = jax.random.normal(key, (B, C, G, G), dtype=jnp.float32)

    out = yolo_layer_forward(x, anchors, num_classes, img_dim)
    out = jax.block_until_ready(out)

    ref = yolo_layer_reference(x, anchors, num_classes, img_dim)
    assert out.shape == (B, len(anchors) * G * G, num_classes + 5), out.shape
    assert jnp.allclose(out, ref, atol=1e-4, rtol=1e-4), "mismatch vs reference"

    print("KERNEL_OK")
</pallas_src>

<mosaic_0001>
module attributes {stable_mosaic.version = 11 : i64} {
  func.func @yolo_kernel(%arg0: i32, %arg1: memref<1x3x8x256xf32, #tpu.memory_space<vmem>>, %arg2: memref<3x4x256xf32, #tpu.memory_space<vmem>>, %arg3: memref<1x3x256x8xf32, #tpu.memory_space<vmem>>, %arg4: memref<3x8x256xf32, #tpu.memory_space<vmem>>) attributes {dimension_semantics = [#tpu.dimension_semantics<parallel>], iteration_bounds = array<i64: 2>, scalar_prefetch = 0 : i64, scratch_operands = 1 : i64, tpu.core_type = #tpu.core_type<tc>, window_params = [{transform_indices = @transform_0, window_bounds = array<i64: 1, 3, 8, 256>}, {pipeline_mode = #tpu.pipeline_mode<synchronous>, transform_indices = @transform_1, window_bounds = array<i64: 3, 4, 256>}, {transform_indices = @transform_2, window_bounds = array<i64: 1, 3, 256, 8>}]} {
    %c0 = arith.constant 0 : index
    %c0_0 = arith.constant 0 : index
    %c0_1 = arith.constant 0 : index
    %c0_2 = arith.constant 0 : index
    %0 = vector.load %arg1[%c0, %c0_0, %c0_1, %c0_2] : memref<1x3x8x256xf32, #tpu.memory_space<vmem>>, vector<1x3x8x256xf32>
    %1 = vector.shape_cast %0 : vector<1x3x8x256xf32> to vector<3x8x256xf32>
    %2 = arith.negf %1 : vector<3x8x256xf32>
    %3 = math.exp %2 : vector<3x8x256xf32>
    %cst = arith.constant 1.000000e+00 : f32
    %4 = vector.broadcast %cst : f32 to vector<3x8x256xf32>
    %5 = arith.addf %4, %3 : vector<3x8x256xf32>
    %6 = arith.divf %4, %5 : vector<3x8x256xf32>
    %c0_3 = arith.constant 0 : index
    %c0_4 = arith.constant 0 : index
    %c0_5 = arith.constant 0 : index
    %7 = vector.load %arg4[%c0_3, %c0_4, %c0_5] : memref<3x8x256xf32, #tpu.memory_space<vmem>>, vector<3x8x256xf32>
    tpu.vector_store %arg4[%c0_3, %c0_4, %c0_5], %6 {strides = array<i32>} : memref<3x8x256xf32, #tpu.memory_space<vmem>>, vector<3x8x256xf32>,
    %8 = vector.extract_strided_slice %6 {offsets = [0, 0, 0], sizes = [3, 2, 256], strides = [1, 1, 1]} : vector<3x8x256xf32> to vector<3x2x256xf32>
    %c0_6 = arith.constant 0 : index
    %c0_7 = arith.constant 0 : index
    %c0_8 = arith.constant 0 : index
    %9 = vector.load %arg2[%c0_6, %c0_7, %c0_8] : memref<3x4x256xf32, #tpu.memory_space<vmem>>, vector<3x2x256xf32>
    %10 = arith.addf %8, %9 : vector<3x2x256xf32>
    %cst_9 = arith.constant 2.600000e+01 : f32
    %11 = vector.broadcast %cst_9 : f32 to vector<3x2x256xf32>
    %12 = arith.mulf %10, %11 : vector<3x2x256xf32>
    %c0_10 = arith.constant 0 : index
    %c0_11 = arith.constant 0 : index
    %c0_12 = arith.constant 0 : index
    %13 = vector.load %arg4[%c0_10, %c0_11, %c0_12] : memref<3x8x256xf32, #tpu.memory_space<vmem>>, vector<3x2x256xf32>
    tpu.vector_store %arg4[%c0_10, %c0_11, %c0_12], %12 {strides = array<i32>} : memref<3x8x256xf32, #tpu.memory_space<vmem>>, vector<3x2x256xf32>,
    %14 = vector.extract_strided_slice %1 {offsets = [0, 2, 0], sizes = [3, 2, 256], strides = [1, 1, 1]} : vector<3x8x256xf32> to vector<3x2x256xf32>
    %15 = math.exp %14 : vector<3x2x256xf32>
    %c0_13 = arith.constant 0 : index
    %c2 = arith.constant 2 : index
    %c0_14 = arith.constant 0 : index
    %16 = vector.load %arg2[%c0_13, %c2, %c0_14] : memref<3x4x256xf32, #tpu.memory_space<vmem>>, vector<3x2x256xf32>
    %17 = arith.mulf %15, %16 : vector<3x2x256xf32>
    %cst_15 = arith.constant 2.600000e+01 : f32
    %18 = vector.broadcast %cst_15 : f32 to vector<3x2x256xf32>
    %19 = arith.mulf %17, %18 : vector<3x2x256xf32>
    %c0_16 = arith.constant 0 : index
    %c2_17 = arith.constant 2 : index
    %c0_18 = arith.constant 0 : index
    %20 = vector.load %arg4[%c0_16, %c2_17, %c0_18] : memref<3x8x256xf32, #tpu.memory_space<vmem>>, vector<3x2x256xf32>
    tpu.vector_store %arg4[%c0_16, %c2_17, %c0_18], %19 {strides = array<i32>} : memref<3x8x256xf32, #tpu.memory_space<vmem>>, vector<3x2x256xf32>,
    %c0_19 = arith.constant 0 : index
    %c0_20 = arith.constant 0 : index
    %c0_21 = arith.constant 0 : index
    %21 = vector.load %arg4[%c0_19, %c0_20, %c0_21] : memref<3x8x256xf32, #tpu.memory_space<vmem>>, vector<1x8x256xf32>
    %22 = vector.shape_cast %21 : vector<1x8x256xf32> to vector<8x256xf32>
    %23 = tpu.transpose %22, [1, 0] : vector<8x256xf32> -> vector<256x8xf32>
    %c0_22 = arith.constant 0 : index
    %c0_23 = arith.constant 0 : index
    %c0_24 = arith.constant 0 : index
    %c0_25 = arith.constant 0 : index
    %24 = vector.load %arg3[%c0_22, %c0_23, %c0_24, %c0_25] : memref<1x3x256x8xf32, #tpu.memory_space<vmem>>, vector<1x1x256x8xf32>
    %25 = vector.shape_cast %24 : vector<1x1x256x8xf32> to vector<256x8xf32>
    %26 = vector.shape_cast %23 : vector<256x8xf32> to vector<1x1x256x8xf32>
    tpu.vector_store %arg3[%c0_22, %c0_23, %c0_24, %c0_25], %26 {strides = array<i32>} : memref<1x3x256x8xf32, #tpu.memory_space<vmem>>, vector<1x1x256x8xf32>,
    %c1 = arith.constant 1 : index
    %c0_26 = arith.constant 0 : index
    %c0_27 = arith.constant 0 : index
    %27 = vector.load %arg4[%c1, %c0_26, %c0_27] : memref<3x8x256xf32, #tpu.memory_space<vmem>>, vector<1x8x256xf32>
    %28 = vector.shape_cast %27 : vector<1x8x256xf32> to vector<8x256xf32>
    %29 = tpu.transpose %28, [1, 0] : vector<8x256xf32> -> vector<256x8xf32>
    %c0_28 = arith.constant 0 : index
    %c1_29 = arith.constant 1 : index
    %c0_30 = arith.constant 0 : index
    %c0_31 = arith.constant 0 : index
    %30 = vector.load %arg3[%c0_28, %c1_29, %c0_30, %c0_31] : memref<1x3x256x8xf32, #tpu.memory_space<vmem>>, vector<1x1x256x8xf32>
    %31 = vector.shape_cast %30 : vector<1x1x256x8xf32> to vector<256x8xf32>
    %32 = vector.shape_cast %29 : vector<256x8xf32> to vector<1x1x256x8xf32>
    tpu.vector_store %arg3[%c0_28, %c1_29, %c0_30, %c0_31], %32 {strides = array<i32>} : memref<1x3x256x8xf32, #tpu.memory_space<vmem>>, vector<1x1x256x8xf32>,
    %c2_32 = arith.constant 2 : index
    %c0_33 = arith.constant 0 : index
    %c0_34 = arith.constant 0 : index
    %33 = vector.load %arg4[%c2_32, %c0_33, %c0_34] : memref<3x8x256xf32, #tpu.memory_space<vmem>>, vector<1x8x256xf32>
    %34 = vector.shape_cast %33 : vector<1x8x256xf32> to vector<8x256xf32>
    %35 = tpu.transpose %34, [1, 0] : vector<8x256xf32> -> vector<256x8xf32>
    %c0_35 = arith.constant 0 : index
    %c2_36 = arith.constant 2 : index
    %c0_37 = arith.constant 0 : index
    %c0_38 = arith.constant 0 : index
    %36 = vector.load %arg3[%c0_35, %c2_36, %c0_37, %c0_38] : memref<1x3x256x8xf32, #tpu.memory_space<vmem>>, vector<1x1x256x8xf32>
    %37 = vector.shape_cast %36 : vector<1x1x256x8xf32> to vector<256x8xf32>
    %38 = vector.shape_cast %35 : vector<256x8xf32> to vector<1x1x256x8xf32>
    tpu.vector_store %arg3[%c0_35, %c2_36, %c0_37, %c0_38], %38 {strides = array<i32>} : memref<1x3x256x8xf32, #tpu.memory_space<vmem>>, vector<1x1x256x8xf32>,
    return
  }
  func.func @transform_0(%arg0: i32) -> (i32, i32, i32, i32) {
    %c0_i32 = arith.constant 0 : i32
    %c0_i32_0 = arith.constant 0 : i32
    %c0_i32_1 = arith.constant 0 : i32
    %c0_i32_2 = arith.constant 0 : i32
    return %arg0, %c0_i32, %c0_i32_0, %c0_i32_1 : i32, i32, i32, i32
  }
  func.func @transform_1(%arg0: i32) -> (i32, i32, i32) {
    %c0_i32 = arith.constant 0 : i32
    %c0_i32_0 = arith.constant 0 : i32
    %c0_i32_1 = arith.constant 0 : i32
    %c0_i32_2 = arith.constant 0 : i32
    return %c0_i32, %c0_i32_0, %c0_i32_1 : i32, i32, i32
  }
  func.func @transform_2(%arg0: i32) -> (i32, i32, i32, i32) {
    %c0_i32 = arith.constant 0 : i32
    %c0_i32_0 = arith.constant 0 : i32
    %c0_i32_1 = arith.constant 0 : i32
    %c0_i32_2 = arith.constant 0 : i32
    return %arg0, %c0_i32, %c0_i32_0, %c0_i32_1 : i32, i32, i32, i32
  }
}

</mosaic_0001>

<bundles_post_ra>
// kernel: tpu_custom_call.1
= control target key start
LH: loop header
LB: loop body
LE: loop exit
PB: predicated region body
PF: predicated region fallthrough
CT: control target
= control target key end

     0   :  { %7 = vsyncpa [#allocation4], 0  ;;  %s1311_s0 = inlined_call_operand.hbm [shape: f32[2,3,8,256], index: 0, kind: input, shape index: {}]   ;;  %s1312_s1 = inlined_call_operand.hbm [shape: f32[3,4,256], index: 1, kind: input, shape index: {}]   ;;  %s1313_s2 = inlined_call_operand.vmem [shape: f32[2,3,256,8], index: 2, kind: output, shape index: {}]  }
   0x1   :  { %9 = vsyncpa [#allocation4 + $0x1], 0 }
   0x2   :  { %10 = vsyncpa [#allocation6], 0  ;;  %s975_s9 = smov 0   ;;  %s977_s10 = smov 0  }
   0x3   :  { %s979_s11 = smov 0   ;;  %s981_s12 = smov 0  }
   0x4 LB: > { %s994_s13 = sadd.s32 4294967295, %s952_s12   ;;  %p36_p0 = scmp.ne.s32.totalorder %s944_s10, %s940_s9  ;;  %s952_s12 = sphi %s981_s12, %s1328_s12   ;;  %s948_s11 = sphi %s979_s11, %s1327_s11   ;;  %s944_s10 = sphi %s977_s10, %s1326_s10   ;;  %s940_s9 = sphi %s975_s9, %s1325_s9  }
   0x5   : > { %p1314_p1 = scmp.eq.s32.totalorder %s994_s13, 0  ;;  %p676_p2 = scmp.ge.s32.totalorder %s952_s12, 1 }
   0x6   : > { %p94_p3 = scmp.lt.s32.totalorder %s952_s12, 3  ;;  %s954_s16 = smov [#allocation5]  }
   0x7   : > { %p1002_p4 = por %p1314_p1, %p36_p0  ;;  %s106_s17 = sshll.u32 %s954_s16, 4  ;;  %s107_s17 = int_to_ptr.vmem [resolvable:$true] %s106_s17 }
   0x8   : > { %p1006_p5 = pnand %p676_p2, %p94_p3  ;;  %s1019_s19 = sadd.s32 1, %s952_s12  }
   0x9   : > { %s1317_s14 = scalar_select %p1002_p4, 1, 0 }
   0xa   : > { %s1318_s15 = scalar_select %p1006_p5, 1, 0 }
   0xb   : > { %p765_p6 = pneg %p1006_p5  ;;  %s23_s20 = sadd.s32 1, %s948_s11 }
   0xc   : > { %s20_s21 = ssub.s32 %s952_s12, %s1019_s19  ;;  %s856_s24 = scalar_lea.hbm %s1312_s1, 384 }
   0xd   : > { %p1014_p7 = pnand %p765_p6, %p1314_p1  ;;  %p857_p8 = scmp.ne.s32.totalorder %s1312_s1, %s856_s24 }
   0xe   : > { %p863_p12 = scmp.lt.u32.totalorder %s856_s24, %s1312_s1 }
   0xf   : > { %p858_p9 = pneg %p1014_p7 }
  0x11   : > { %p859_p10 = pnand %p858_p9, %p857_p8 }
  0x13   : > { %p860_p11 = pneg %p859_p10 }
  0x15   : > { %p865_p13 = pnand %p863_p12, %p860_p11 }
  0x17   : > { %868 = shalt.err (!%p865_p13)
}
  0x18   : > { %s869_s29 = scalar_lea.vmem %s107_s17, 384  ;;  %p877_p6 = scmp.lt.s32.totalorder %s107_s17, %s107_s17 }
  0x19   : > { %p870_p0 = scmp.ne.s32.totalorder %s107_s17, %s869_s29  ;;  %p878_p1 = scmp.lt.s32.totalorder %s869_s29, %s869_s29 }
  0x1b   : > { %p872_p2 = pnand %p870_p0, %p858_p9  ;;  %p879_p4 = por %p878_p1, %p877_p6 }
  0x1d   : > { %p873_p3 = pneg %p872_p2 }
  0x1f   : > { %p880_p5 = pnand %p879_p4, %p873_p3 }
  0x21   : > { %883 = shalt.err (!%p880_p5)
}
  0x22   : > { %s955_s30 = smov 128   ;;  %s956_s3 = smov 8  }
  0x23   : > { %768 = dma.hbm_to_vmem [thread:$0]  (!%p1014_p7), %s1312_s1, 384, %s107_s17, [#allocation6], %s955_s30, %s955_s30, %s956_s3  }
  0x24   : > { %p21_p8 = scmp.eq.s32.totalorder %s20_s21, 0  ;;  %p30_p9 = scmp.ne.s32.totalorder %s948_s11, %s944_s10 }
  0x25   : > { %p31_p1 = scmp.eq.s32.totalorder %s952_s12, 0  ;;  %p774_p4 = scmp.lt.s32.totalorder %s952_s12, 2 }
  0x26   : > { %s1045_s6 = scalar_select %p21_p8, %s948_s11, %s23_s20  }
  0x27   : > { %p32_p5 = por %p31_p1, %p30_p9  ;;  %s120_s7 = sand.u32 1, %s948_s11  }
  0x28   : > { %s755_s8 = smul.u32 48, %s120_s7  ;;  %s889_s26 = scalar_lea.hbm %s1311_s0, 1536 }
  0x29   : > { %s756_s9 = smul.u32 768, %s952_s12  ;;  %p1049_p10 = pnand %p774_p4, %p32_p5 }
  0x2a   : > { %s124_s20 = scalar_lea.vmem [#allocation3], %s755_s8  ;;  %s1060_s12 = scalar_lea.sflag [#allocation4], %s120_s7 }
  0x2b   : > { %s1056_s17 = scalar_lea.hbm %s1311_s0, %s756_s9  ;;  %s131_s21 = sshll.u32 %s124_s20, 4  ;;  %s1058_s21 = int_to_ptr.vmem [resolvable:$true] %s131_s21 }
  0x2c   : > { %s884_s23 = scalar_lea.hbm %s1056_s17, 768  ;;  %p886_p11 = pneg %p1049_p10 }
  0x2d   : > { %p885_p7 = scmp.ne.s32.totalorder %s1056_s17, %s884_s23  ;;  %p890_p0 = scmp.lt.u32.totalorder %s1056_s17, %s1311_s0 }
  0x2e   : > { %p891_p2 = scmp.lt.u32.totalorder %s889_s26, %s884_s23  ;;  %p893_p6 = scmp.lt.u32.totalorder %s884_s23, %s1056_s17 }
  0x2f   : > { %p887_p12 = pnand %p886_p11, %p885_p7 }
  0x30   : > { %p892_p3 = por %p891_p2, %p890_p0 }
  0x31   : > { %p888_p13 = pneg %p887_p12 }
  0x32   : > { %p894_p8 = por %p893_p6, %p892_p3 }
  0x34   : > { %p895_p9 = pnand %p894_p8, %p888_p13 }
  0x36   : > { %898 = shalt.err (!%p895_p9)
}
  0x37   : > { %s899_s29 = scalar_lea.vmem %s1058_s21, 768  ;;  %s957_s30 = smov [#allocation3]  }
  0x38   : > { %p900_p1 = scmp.ne.s32.totalorder %s1058_s21, %s899_s29  ;;  %s904_s3 = sshll.u32 %s957_s30, 4  ;;  %s905_s3 = int_to_ptr.vmem [resolvable:$false] %s904_s3 }
  0x39   : > { %s906_s4 = scalar_lea.vmem %s905_s3, 1536  ;;  %p907_p7 = scmp.lt.s32.totalorder %s1058_s21, %s905_s3 }
  0x3a   : > { %p902_p4 = pnand %p900_p1, %p886_p11  ;;  %p908_p12 = scmp.lt.s32.totalorder %s906_s4, %s899_s29 }
  0x3c   : > { %p903_p5 = pneg %p902_p4  ;;  %p909_p0 = por %p908_p12, %p907_p7 }
  0x3e   : > { %p910_p2 = pnand %p909_p0, %p903_p5 }
  0x40   : > { %913 = shalt.err (!%p910_p2)
}
  0x41   : > { %s958_s5 = smov 256   ;;  %s959_s7 = smov 16  }
  0x42   : > { %772 = dma.hbm_to_vmem [thread:$0]  (!%p1049_p10), %s1056_s17, 768, %s1058_s21, %s1060_s12, %s958_s5, %s958_s5, %s959_s7  }
  0x43   : > { %p1321_p11 = scmp.ne.s32.totalorder %s1318_s15, 0 }
  0x44   : > { %s145_s8 = sand.u32 (!%p1321_p11), 1, %s944_s10   ;;  %p1322_p13 = scmp.ne.s32.totalorder (!%p1321_p11), %s1317_s14, 0 }
  0x45   : > { %143 = sbr.rel (%p1321_p11) target bundleno = 438 (0x1b6), region = 28  ;;  %s146_s22 = scalar_lea.sflag (!%p1321_p11), [#allocation4], %s145_s8 }
  0x46   : > { %s757_s9 = smul.u32 (!%p1321_p11), 48, %s145_s8 }
  0x48   : > { %s149_s18 = scalar_lea.vmem (!%p1321_p11), [#allocation3], %s757_s9 }
  0x4c   : > { %931 = dma.done.wait (%p1322_p13), %s146_s22, 768  }
  0x4d   : > { %933 = vsyncadd (%p1322_p13), %s146_s22, 4294966528  ;;  %p1323_p3 = scmp.eq.s32.totalorder %s994_s13, 0 }
  0x4f   : > { %935 = dma.done.wait (%p1323_p3), [#allocation6], 384   ;;  %p1324_p6 = pmov %p1323_p3 }
  0x50   : > { %v181_v0 = vld [vmem:[%s149_s18 + $0x10] sm:$0xff]  ;;  %v179_v2 = vld [vmem:[%s149_s18] sm:$0xff]  ;;  %v182_v3 = vld [vmem:[%s149_s18 + $0x18] sm:$0xff]  ;;  %p174_p10 = scmp.lt.s32.totalorder %s994_s13, 1  ;;  %vm365_vm0 = vcmask 64512  }
  0x51   : > { %937 = vsyncadd (%p1324_p6), [#allocation6], 4294966912  ;;  %v685_v1 = vmul.f32 -1.442695, %v181_v0  ;;  %v261_v4 = vmul.f32 1.442695, %v181_v0 }
  0x52   : > { %v683_v5 = vmul.f32 -1.442695, %v179_v2  ;;  %v686_v6 = vmul.f32 -1.442695, %v182_v3  ;;  %v257_v7 = vmul.f32 1.442695, %v179_v2 }
  0x53   : > { %820 = vpow2.f32 %v685_v1  ;;  %v180_v8 = vld [vmem:[%s149_s18 + $0x8] sm:$0xff]  ;;  %v263_v11 = vmul.f32 1.442695, %v182_v3  ;;  %v183_v12 = vld [vmem:[%s149_s18 + $0x20] sm:$0xff]  ;;  %s1330_s13 = smov (!%p174_p10, %s994_s13), 1 }
  0x54   : > { %v184_v9 = vld [vmem:[%s149_s18 + $0x28] sm:$0xff]  ;;  %822 = vpow2.f32 %v683_v5  ;;  %v684_v10 = vmul.f32 -1.442695, %v180_v8  ;;  %v259_v14 = vmul.f32 1.442695, %v180_v8  ;;  %s758_s14 = smul.u32 768, %s1330_s13 }
  0x55   : > { %824 = vpow2.f32 %v261_v4  ;;  %v688_v13 = vmul.f32 -1.442695, %v184_v9  ;;  %v687_v15 = vmul.f32 -1.442695, %v183_v12  ;;  %v267_v16 = vmul.f32 1.442695, %v184_v9 }
  0x56   : > { %826 = vpow2.f32 %v686_v6  ;;  %v265_v22 = vmul.f32 1.442695, %v183_v12  ;;  %v270_v24 = vld [vmem:[#allocation5 + $0x8] sm:$0xcc]  ;;  %v269_v28 = vld [vmem:[#allocation5] sm:$0xcc]  ;;  %s1104_s17 = scalar_lea.vmem %s1313_s2, %s758_s14 }
  0x57   : > { %828 = vpow2.f32 %v257_v7  ;;  %v276_v30 = vcombine.high %v270_v24, %v270_v24  ;;  %v271_v33 = vld [vmem:[#allocation5 + $0x10] sm:$0xcc]  ;;  %v275_v36 = vcombine.high %v269_v28, %v269_v28  ;;  %v228_v41 = vld [vmem:[#allocation5 + $0x8] sm:$0x33]  ;;  %v227_v47 = vld [vmem:[#allocation5] sm:$0x33] }
  0x58   : > { %830 = vpow2.f32 %v684_v10  ;;  %v277_v40 = vcombine.high %v271_v33, %v271_v33  ;;  %v234_v50 = vcombine.high %v228_v41, %v228_v41  ;;  %v229_v54 = vld [vmem:[#allocation5 + $0x10] sm:$0x33]  ;;  %v233_v58 = vcombine.high %v227_v47, %v227_v47 }
  0x59   : > { %832 = vpow2.f32 %v263_v11  ;;  %v235_v1 = vcombine.high %v229_v54, %v229_v54 }
  0x5a   : > { %834 = vpow2.f32 %v688_v13 }
  0x5b   : > { %836 = vpow2.f32 %v259_v14 }
  0x5c   : > { %838 = vpow2.f32 %v687_v15 }
  0x5d   : > { %v821_v17 = vpop.eup %820  ;;  %840 = vpow2.f32 %v267_v16 }
  0x5e   : > { %v205_v18 = vadd.f32 1.0, %v821_v17  ;;  %v823_v19 = vpop.eup %822 }
  0x5f   : > { %v825_v20 = vpop.eup %824  ;;  %v203_v21 = vadd.f32 1.0, %v823_v19 }
  0x60   : > { %842 = vrcp.f32 %v205_v18  ;;  %v827_v23 = vpop.eup %826  ;;  %v283_v31 = vmul.f32 %v825_v20, %v270_v24 }
  0x61   : > { %v829_v25 = vpop.eup %828  ;;  %844 = vrcp.f32 %v203_v21  ;;  %v206_v26 = vadd.f32 1.0, %v827_v23 }
  0x62   : > { %v831_v27 = vpop.eup %830  ;;  %846 = vpow2.f32 %v265_v22  ;;  %v281_v37 = vmul.f32 %v829_v25, %v269_v28  ;;  %v289_v42 = vmul.f32 26.0, %v283_v31 }
  0x63   : > { %v833_v29 = vpop.eup %832  ;;  %848 = vrcp.f32 %v206_v26  ;;  %v204_v32 = vadd.f32 1.0, %v831_v27 }
  0x64   : > { %v835_v34 = vpop.eup %834  ;;  %v284_v43 = vmul.f32 %v833_v29, %v276_v30  ;;  %v287_v48 = vmul.f32 26.0, %v281_v37 }
  0x65   : > { %v837_v35 = vpop.eup %836  ;;  %850 = vrcp.f32 %v204_v32  ;;  %v208_v38 = vadd.f32 1.0, %v835_v34 }
  0x66   : > { %v839_v39 = vpop.eup %838  ;;  %v282_v49 = vmul.f32 %v837_v35, %v275_v36  ;;  %v290_v53 = vmul.f32 26.0, %v284_v43 }
  0x67   : > { %852 = vrcp.f32 %v208_v38  ;;  %v207_v44 = vadd.f32 1.0, %v839_v39  ;;  %v841_v45 = vpop.eup %840 }
  0x68   : > { %v286_v55 = vmul.f32 %v841_v45, %v277_v40  ;;  %v288_v61 = vmul.f32 26.0, %v282_v49 }
  0x69   : > { %854 = vrcp.f32 %v207_v44 }
  0x6a   : > { %v843_v46 = vpop.eup %842  ;;  %v292_v3 = vmul.f32 26.0, %v286_v55 }
  0x6b   : > { %223 = vst [vmem:[#allocation2 + $0x10] sm:$0xff] %v843_v46  ;;  %v241_v51 = vadd.f32 %v843_v46, %v228_v41  ;;  %v845_v52 = vpop.eup %844 }
  0x6c   : > { %295 = vst [vmem:[#allocation2 + $0x10] sm:$0xc] %v289_v42  ;;  %v847_v56 = vpop.eup %846  ;;  %221 = vst [vmem:[#allocation2] sm:$0xff] %v845_v52  ;;  %v239_v59 = vadd.f32 %v845_v52, %v227_v47 }
  0x6d   : > { %v247_v57 = vmul.f32 26.0, %v241_v51  ;;  %v849_v60 = vpop.eup %848  ;;  %293 = vst [vmem:[#allocation2] sm:$0xc] %v287_v48  ;;  %v285_v62 = vmul.f32 %v847_v56, %v271_v33 }
  0x6e   : > { %v245_v63 = vmul.f32 26.0, %v239_v59  ;;  %224 = vst [vmem:[#allocation2 + $0x18] sm:$0xff] %v849_v60  ;;  %v242_v0 = vadd.f32 %v849_v60, %v234_v50 }
  0x6f   : > { %253 = vst [vmem:[#allocation2 + $0x10] sm:$0x3] %v247_v57  ;;  %v851_v2 = vpop.eup %850  ;;  %296 = vst [vmem:[#allocation2 + $0x18] sm:$0xc] %v290_v53  ;;  %v291_v7 = vmul.f32 26.0, %v285_v62 }
  0x70   : > { %251 = vst [vmem:[#allocation2] sm:$0x3] %v245_v63  ;;  %v248_v4 = vmul.f32 26.0, %v242_v0  ;;  %222 = vst [vmem:[#allocation2 + $0x8] sm:$0xff] %v851_v2  ;;  %v240_v5 = vadd.f32 %v851_v2, %v233_v58 }
  0x71   : > { %v853_v6 = vpop.eup %852  ;;  %294 = vst [vmem:[#allocation2 + $0x8] sm:$0xc] %v288_v61 }
  0x72   : > { %254 = vst [vmem:[#allocation2 + $0x18] sm:$0x3] %v248_v4  ;;  %v246_v8 = vmul.f32 26.0, %v240_v5  ;;  %226 = vst [vmem:[#allocation2 + $0x28] sm:$0xff] %v853_v6  ;;  %v244_v9 = vadd.f32 %v853_v6, %v235_v1 }
  0x73   : > { %v855_v10 = vpop.eup %854  ;;  %298 = vst [vmem:[#allocation2 + $0x28] sm:$0xc] %v292_v3 }
  0x74   : > { %252 = vst [vmem:[#allocation2 + $0x8] sm:$0x3] %v246_v8  ;;  %v250_v11 = vmul.f32 26.0, %v244_v9  ;;  %225 = vst [vmem:[#allocation2 + $0x20] sm:$0xff] %v855_v10  ;;  %v243_v12 = vadd.f32 %v855_v10, %v229_v54 }
  0x75   : > { %297 = vst [vmem:[#allocation2 + $0x20] sm:$0xc] %v291_v7 }
  0x76   : > { %v399_v13 = vld [vmem:[#allocation2 + $0x10] sm:$0xff]  ;;  %256 = vst [vmem:[#allocation2 + $0x28] sm:$0x3] %v250_v11  ;;  %v249_v14 = vmul.f32 26.0, %v243_v12 }
  0x77   : > { %401 = vxpose.xlu1.b32.start.end [1/1] (short) %v399_v13, 128  ;;  %v299_v15 = vld [vmem:[#allocation2] sm:$0xff] }
  0x78   : > { %301 = vxpose.xlu0.b32.start.end [1/1] (short) %v299_v15, 128  ;;  %255 = vst [vmem:[#allocation2 + $0x20] sm:$0x3] %v249_v14 }
  0x79   : > { %v400_v16 = vld [vmem:[#allocation2 + $0x18] sm:$0xff] }
  0x7b   : > { %v300_v17 = vld [vmem:[#allocation2 + $0x8] sm:$0xff] }
  0x7d   : > { %v500_v18 = vld [vmem:[#allocation2 + $0x28] sm:$0xff] }
  0x7f   : > { %v499_v19 = vld [vmem:[#allocation2 + $0x20] sm:$0xff] }
  0xb4   : > { %433 = vxpose.xlu1.b32.start.end [1/1] (short) %v400_v16, 128 }
  0xb5   : > { %333 = vxpose.xlu0.b32.start.end [1/1] (short) %v300_v17, 128 }
  0xf1   : > { %533 = vxpose.xlu1.b32.start.end [1/1] (short) %v500_v18, 128 }
  0xf2   : > { %501 = vxpose.xlu0.b32.start.end [1/1] (short) %v499_v19, 128 }
  0xf7   : > { %v417_v20 = vpop.trf.xlu1 }
  0xf8   : > { %689 = vst.msk [vmem:[%s1104_s17 + $0x100] sm:$0xff] %vm365_vm0, %v417_v20  ;;  %v317_v21 = vpop.trf.xlu0 }
  0xf9   : > { %366 = vst.msk [vmem:[%s1104_s17] sm:$0xff] %vm365_vm0, %v317_v21 }
  0xfb   : > { %v418_v22 = vpop.trf.xlu1 }
  0xfc   : > { %690 = vst.msk [vmem:[%s1104_s17 + $0x108] sm:$0xff] %vm365_vm0, %v418_v22  ;;  %v318_v23 = vpop.trf.xlu0 }
  0xfd   : > { %367 = vst.msk [vmem:[%s1104_s17 + $0x8] sm:$0xff] %vm365_vm0, %v318_v23 }
  0xff   : > { %v419_v24 = vpop.trf.xlu1 }
 0x100   : > { %691 = vst.msk [vmem:[%s1104_s17 + $0x110] sm:$0xff] %vm365_vm0, %v419_v24  ;;  %v319_v25 = vpop.trf.xlu0 }
 0x101   : > { %368 = vst.msk [vmem:[%s1104_s17 + $0x10] sm:$0xff] %vm365_vm0, %v319_v25 }
 0x103   : > { %v420_v26 = vpop.trf.xlu1 }
 0x104   : > { %692 = vst.msk [vmem:[%s1104_s17 + $0x118] sm:$0xff] %vm365_vm0, %v420_v26  ;;  %v320_v27 = vpop.trf.xlu0 }
 0x105   : > { %369 = vst.msk [vmem:[%s1104_s17 + $0x18] sm:$0xff] %vm365_vm0, %v320_v27 }
 0x107   : > { %v421_v28 = vpop.trf.xlu1 }
 0x108   : > { %693 = vst.msk [vmem:[%s1104_s17 + $0x120] sm:$0xff] %vm365_vm0, %v421_v28  ;;  %v321_v29 = vpop.trf.xlu0 }
 0x109   : > { %370 = vst.msk [vmem:[%s1104_s17 + $0x20] sm:$0xff] %vm365_vm0, %v321_v29 }
 0x10b   : > { %v422_v30 = vpop.trf.xlu1 }
 0x10c   : > { %694 = vst.msk [vmem:[%s1104_s17 + $0x128] sm:$0xff] %vm365_vm0, %v422_v30  ;;  %v322_v31 = vpop.trf.xlu0 }
 0x10d   : > { %371 = vst.msk [vmem:[%s1104_s17 + $0x28] sm:$0xff] %vm365_vm0, %v322_v31 }
 0x10f   : > { %v423_v32 = vpop.trf.xlu1 }
 0x110   : > { %695 = vst.msk [vmem:[%s1104_s17 + $0x130] sm:$0xff] %vm365_vm0, %v423_v32  ;;  %v323_v33 = vpop.trf.xlu0 }
 0x111   : > { %372 = vst.msk [vmem:[%s1104_s17 + $0x30] sm:$0xff] %vm365_vm0, %v323_v33 }
 0x113   : > { %v424_v34 = vpop.trf.xlu1 }
 0x114   : > { %696 = vst.msk [vmem:[%s1104_s17 + $0x138] sm:$0xff] %vm365_vm0, %v424_v34  ;;  %v324_v35 = vpop.trf.xlu0 }
 0x115   : > { %373 = vst.msk [vmem:[%s1104_s17 + $0x38] sm:$0xff] %vm365_vm0, %v324_v35 }
 0x117   : > { %v425_v36 = vpop.trf.xlu1 }
 0x118   : > { %697 = vst.msk [vmem:[%s1104_s17 + $0x140] sm:$0xff] %vm365_vm0, %v425_v36  ;;  %v325_v37 = vpop.trf.xlu0 }
 0x119   : > { %374 = vst.msk [vmem:[%s1104_s17 + $0x40] sm:$0xff] %vm365_vm0, %v325_v37 }
 0x11b   : > { %v426_v38 = vpop.trf.xlu1 }
 0x11c   : > { %698 = vst.msk [vmem:[%s1104_s17 + $0x148] sm:$0xff] %vm365_vm0, %v426_v38  ;;  %v326_v39 = vpop.trf.xlu0 }
 0x11d   : > { %375 = vst.msk [vmem:[%s1104_s17 + $0x48] sm:$0xff] %vm365_vm0, %v326_v39 }
 0x11f   : > { %v427_v40 = vpop.trf.xlu1 }
 0x120   : > { %699 = vst.msk [vmem:[%s1104_s17 + $0x150] sm:$0xff] %vm365_vm0, %v427_v40  ;;  %v327_v41 = vpop.trf.xlu0 }
 0x121   : > { %376 = vst.msk [vmem:[%s1104_s17 + $0x50] sm:$0xff] %vm365_vm0, %v327_v41 }
 0x123   : > { %v428_v42 = vpop.trf.xlu1 }
 0x124   : > { %700 = vst.msk [vmem:[%s1104_s17 + $0x158] sm:$0xff] %vm365_vm0, %v428_v42  ;;  %v328_v43 = vpop.trf.xlu0 }
 0x125   : > { %377 = vst.msk [vmem:[%s1104_s17 + $0x58] sm:$0xff] %vm365_vm0, %v328_v43 }
 0x127   : > { %v429_v44 = vpop.trf.xlu1 }
 0x128   : > { %701 = vst.msk [vmem:[%s1104_s17 + $0x160] sm:$0xff] %vm365_vm0, %v429_v44  ;;  %v329_v45 = vpop.trf.xlu0 }
 0x129   : > { %378 = vst.msk [vmem:[%s1104_s17 + $0x60] sm:$0xff] %vm365_vm0, %v329_v45 }
 0x12b   : > { %v430_v46 = vpop.trf.xlu1 }
 0x12c   : > { %702 = vst.msk [vmem:[%s1104_s17 + $0x168] sm:$0xff] %vm365_vm0, %v430_v46  ;;  %v330_v47 = vpop.trf.xlu0 }
 0x12d   : > { %379 = vst.msk [vmem:[%s1104_s17 + $0x68] sm:$0xff] %vm365_vm0, %v330_v47 }
 0x12f   : > { %v431_v48 = vpop.trf.xlu1 }
 0x130   : > { %703 = vst.msk [vmem:[%s1104_s17 + $0x170] sm:$0xff] %vm365_vm0, %v431_v48  ;;  %v331_v49 = vpop.trf.xlu0 }
 0x131   : > { %380 = vst.msk [vmem:[%s1104_s17 + $0x70] sm:$0xff] %vm365_vm0, %v331_v49 }
 0x133   : > { %v432_v50 = vpop.trf.xlu1 }
 0x134   : > { %704 = vst.msk [vmem:[%s1104_s17 + $0x178] sm:$0xff] %vm365_vm0, %v432_v50  ;;  %v332_v51 = vpop.trf.xlu0 }
 0x135   : > { %381 = vst.msk [vmem:[%s1104_s17 + $0x78] sm:$0xff] %vm365_vm0, %v332_v51 }
 0x137   : > { %v449_v52 = vpop.trf.xlu1 }
 0x138   : > { %705 = vst.msk [vmem:[%s1104_s17 + $0x180] sm:$0xff] %vm365_vm0, %v449_v52  ;;  %v349_v53 = vpop.trf.xlu0 }
 0x139   : > { %382 = vst.msk [vmem:[%s1104_s17 + $0x80] sm:$0xff] %vm365_vm0, %v349_v53 }
 0x13b   : > { %v450_v54 = vpop.trf.xlu1 }
 0x13c   : > { %706 = vst.msk [vmem:[%s1104_s17 + $0x188] sm:$0xff] %vm365_vm0, %v450_v54  ;;  %v350_v55 = vpop.trf.xlu0 }
 0x13d   : > { %383 = vst.msk [vmem:[%s1104_s17 + $0x88] sm:$0xff] %vm365_vm0, %v350_v55 }
 0x13f   : > { %v451_v56 = vpop.trf.xlu1 }
 0x140   : > { %707 = vst.msk [vmem:[%s1104_s17 + $0x190] sm:$0xff] %vm365_vm0, %v451_v56  ;;  %v351_v57 = vpop.trf.xlu0 }
 0x141   : > { %384 = vst.msk [vmem:[%s1104_s17 + $0x90] sm:$0xff] %vm365_vm0, %v351_v57 }
 0x143   : > { %v452_v58 = vpop.trf.xlu1 }
 0x144   : > { %708 = vst.msk [vmem:[%s1104_s17 + $0x198] sm:$0xff] %vm365_vm0, %v452_v58  ;;  %v352_v59 = vpop.trf.xlu0 }
 0x145   : > { %385 = vst.msk [vmem:[%s1104_s17 + $0x98] sm:$0xff] %vm365_vm0, %v352_v59 }
 0x147   : > { %v453_v60 = vpop.trf.xlu1 }
 0x148   : > { %709 = vst.msk [vmem:[%s1104_s17 + $0x1a0] sm:$0xff] %vm365_vm0, %v453_v60  ;;  %v353_v61 = vpop.trf.xlu0 }
 0x149   : > { %386 = vst.msk [vmem:[%s1104_s17 + $0xa0] sm:$0xff] %vm365_vm0, %v353_v61 }
 0x14b   : > { %v454_v62 = vpop.trf.xlu1 }
 0x14c   : > { %710 = vst.msk [vmem:[%s1104_s17 + $0x1a8] sm:$0xff] %vm365_vm0, %v454_v62  ;;  %v354_v63 = vpop.trf.xlu0 }
 0x14d   : > { %387 = vst.msk [vmem:[%s1104_s17 + $0xa8] sm:$0xff] %vm365_vm0, %v354_v63 }
 0x14f   : > { %v455_v0 = vpop.trf.xlu1 }
 0x150   : > { %711 = vst.msk [vmem:[%s1104_s17 + $0x1b0] sm:$0xff] %vm365_vm0, %v455_v0  ;;  %v355_v1 = vpop.trf.xlu0 }
 0x151   : > { %388 = vst.msk [vmem:[%s1104_s17 + $0xb0] sm:$0xff] %vm365_vm0, %v355_v1 }
 0x153   : > { %v456_v2 = vpop.trf.xlu1 }
 0x154   : > { %712 = vst.msk [vmem:[%s1104_s17 + $0x1b8] sm:$0xff] %vm365_vm0, %v456_v2  ;;  %v356_v3 = vpop.trf.xlu0 }
 0x155   : > { %389 = vst.msk [vmem:[%s1104_s17 + $0xb8] sm:$0xff] %vm365_vm0, %v356_v3 }
 0x157   : > { %v457_v4 = vpop.trf.xlu1 }
 0x158   : > { %713 = vst.msk [vmem:[%s1104_s17 + $0x1c0] sm:$0xff] %vm365_vm0, %v457_v4  ;;  %v357_v5 = vpop.trf.xlu0 }
 0x159   : > { %390 = vst.msk [vmem:[%s1104_s17 + $0xc0] sm:$0xff] %vm365_vm0, %v357_v5 }
 0x15b   : > { %v458_v6 = vpop.trf.xlu1 }
 0x15c   : > { %714 = vst.msk [vmem:[%s1104_s17 + $0x1c8] sm:$0xff] %vm365_vm0, %v458_v6  ;;  %v358_v7 = vpop.trf.xlu0 }
 0x15d   : > { %391 = vst.msk [vmem:[%s1104_s17 + $0xc8] sm:$0xff] %vm365_vm0, %v358_v7 }
 0x15f   : > { %v459_v8 = vpop.trf.xlu1 }
 0x160   : > { %715 = vst.msk [vmem:[%s1104_s17 + $0x1d0] sm:$0xff] %vm365_vm0, %v459_v8  ;;  %v359_v9 = vpop.trf.xlu0 }
 0x161   : > { %392 = vst.msk [vmem:[%s1104_s17 + $0xd0] sm:$0xff] %vm365_vm0, %v359_v9 }
 0x163   : > { %v460_v10 = vpop.trf.xlu1 }
 0x164   : > { %716 = vst.msk [vmem:[%s1104_s17 + $0x1d8] sm:$0xff] %vm365_vm0, %v460_v10  ;;  %v360_v11 = vpop.trf.xlu0 }
 0x165   : > { %393 = vst.msk [vmem:[%s1104_s17 + $0xd8] sm:$0xff] %vm365_vm0, %v360_v11 }
 0x167   : > { %v461_v12 = vpop.trf.xlu1 }
 0x168   : > { %717 = vst.msk [vmem:[%s1104_s17 + $0x1e0] sm:$0xff] %vm365_vm0, %v461_v12  ;;  %v361_v13 = vpop.trf.xlu0 }
 0x169   : > { %394 = vst.msk [vmem:[%s1104_s17 + $0xe0] sm:$0xff] %vm365_vm0, %v361_v13 }
 0x16b   : > { %v462_v14 = vpop.trf.xlu1 }
 0x16c   : > { %718 = vst.msk [vmem:[%s1104_s17 + $0x1e8] sm:$0xff] %vm365_vm0, %v462_v14  ;;  %v362_v15 = vpop.trf.xlu0 }
 0x16d   : > { %395 = vst.msk [vmem:[%s1104_s17 + $0xe8] sm:$0xff] %vm365_vm0, %v362_v15 }
 0x16f   : > { %v463_v16 = vpop.trf.xlu1 }
 0x170   : > { %719 = vst.msk [vmem:[%s1104_s17 + $0x1f0] sm:$0xff] %vm365_vm0, %v463_v16  ;;  %v363_v17 = vpop.trf.xlu0 }
 0x171   : > { %396 = vst.msk [vmem:[%s1104_s17 + $0xf0] sm:$0xff] %vm365_vm0, %v363_v17 }
 0x173   : > { %v464_v18 = vpop.trf.xlu1 }
 0x174   : > { %720 = vst.msk [vmem:[%s1104_s17 + $0x1f8] sm:$0xff] %vm365_vm0, %v464_v18  ;;  %v364_v19 = vpop.trf.xlu0 }
 0x175   : > { %397 = vst.msk [vmem:[%s1104_s17 + $0xf8] sm:$0xff] %vm365_vm0, %v364_v19 }
 0x177   : > { %v549_v20 = vpop.trf.xlu1 }
 0x178   : > { %737 = vst.msk [vmem:[%s1104_s17 + $0x280] sm:$0xff] %vm365_vm0, %v549_v20  ;;  %v517_v21 = vpop.trf.xlu0 }
 0x179   : > { %721 = vst.msk [vmem:[%s1104_s17 + $0x200] sm:$0xff] %vm365_vm0, %v517_v21 }
 0x17b   : > { %v550_v22 = vpop.trf.xlu1 }
 0x17c   : > { %738 = vst.msk [vmem:[%s1104_s17 + $0x288] sm:$0xff] %vm365_vm0, %v550_v22  ;;  %v518_v23 = vpop.trf.xlu0 }
 0x17d   : > { %722 = vst.msk [vmem:[%s1104_s17 + $0x208] sm:$0xff] %vm365_vm0, %v518_v23 }
 0x17f   : > { %v551_v24 = vpop.trf.xlu1 }
 0x180   : > { %739 = vst.msk [vmem:[%s1104_s17 + $0x290] sm:$0xff] %vm365_vm0, %v551_v24  ;;  %v519_v25 = vpop.trf.xlu0 }
 0x181   : > { %723 = vst.msk [vmem:[%s1104_s17 + $0x210] sm:$0xff] %vm365_vm0, %v519_v25 }
 0x183   : > { %v552_v26 = vpop.trf.xlu1 }
 0x184   : > { %740 = vst.msk [vmem:[%s1104_s17 + $0x298] sm:$0xff] %vm365_vm0, %v552_v26  ;;  %v520_v27 = vpop.trf.xlu0 }
 0x185   : > { %724 = vst.msk [vmem:[%s1104_s17 + $0x218] sm:$0xff] %vm365_vm0, %v520_v27 }
 0x187   : > { %v553_v28 = vpop.trf.xlu1 }
 0x188   : > { %741 = vst.msk [vmem:[%s1104_s17 + $0x2a0] sm:$0xff] %vm365_vm0, %v553_v28  ;;  %v521_v29 = vpop.trf.xlu0 }
 0x189   : > { %725 = vst.msk [vmem:[%s1104_s17 + $0x220] sm:$0xff] %vm365_vm0, %v521_v29 }
 0x18b   : > { %v554_v30 = vpop.trf.xlu1 }
 0x18c   : > { %742 = vst.msk [vmem:[%s1104_s17 + $0x2a8] sm:$0xff] %vm365_vm0, %v554_v30  ;;  %v522_v31 = vpop.trf.xlu0 }
 0x18d   : > { %726 = vst.msk [vmem:[%s1104_s17 + $0x228] sm:$0xff] %vm365_vm0, %v522_v31 }
 0x18f   : > { %v555_v32 = vpop.trf.xlu1 }
 0x190   : > { %743 = vst.msk [vmem:[%s1104_s17 + $0x2b0] sm:$0xff] %vm365_vm0, %v555_v32  ;;  %v523_v33 = vpop.trf.xlu0 }
 0x191   : > { %727 = vst.msk [vmem:[%s1104_s17 + $0x230] sm:$0xff] %vm365_vm0, %v523_v33 }
 0x193   : > { %v556_v34 = vpop.trf.xlu1 }
 0x194   : > { %744 = vst.msk [vmem:[%s1104_s17 + $0x2b8] sm:$0xff] %vm365_vm0, %v556_v34  ;;  %v524_v35 = vpop.trf.xlu0 }
 0x195   : > { %728 = vst.msk [vmem:[%s1104_s17 + $0x238] sm:$0xff] %vm365_vm0, %v524_v35 }
 0x197   : > { %v557_v36 = vpop.trf.xlu1 }
 0x198   : > { %745 = vst.msk [vmem:[%s1104_s17 + $0x2c0] sm:$0xff] %vm365_vm0, %v557_v36  ;;  %v525_v37 = vpop.trf.xlu0 }
 0x199   : > { %729 = vst.msk [vmem:[%s1104_s17 + $0x240] sm:$0xff] %vm365_vm0, %v525_v37 }
 0x19b   : > { %v558_v38 = vpop.trf.xlu1 }
 0x19c   : > { %746 = vst.msk [vmem:[%s1104_s17 + $0x2c8] sm:$0xff] %vm365_vm0, %v558_v38  ;;  %v526_v39 = vpop.trf.xlu0 }
 0x19d   : > { %730 = vst.msk [vmem:[%s1104_s17 + $0x248] sm:$0xff] %vm365_vm0, %v526_v39 }
 0x19f   : > { %v559_v40 = vpop.trf.xlu1 }
 0x1a0   : > { %747 = vst.msk [vmem:[%s1104_s17 + $0x2d0] sm:$0xff] %vm365_vm0, %v559_v40  ;;  %v527_v41 = vpop.trf.xlu0 }
 0x1a1   : > { %731 = vst.msk [vmem:[%s1104_s17 + $0x250] sm:$0xff] %vm365_vm0, %v527_v41 }
 0x1a3   : > { %v560_v42 = vpop.trf.xlu1 }
 0x1a4   : > { %748 = vst.msk [vmem:[%s1104_s17 + $0x2d8] sm:$0xff] %vm365_vm0, %v560_v42  ;;  %v528_v43 = vpop.trf.xlu0 }
 0x1a5   : > { %732 = vst.msk [vmem:[%s1104_s17 + $0x258] sm:$0xff] %vm365_vm0, %v528_v43 }
 0x1a7   : > { %v561_v44 = vpop.trf.xlu1 }
 0x1a8   : > { %749 = vst.msk [vmem:[%s1104_s17 + $0x2e0] sm:$0xff] %vm365_vm0, %v561_v44  ;;  %v529_v45 = vpop.trf.xlu0 }
 0x1a9   : > { %733 = vst.msk [vmem:[%s1104_s17 + $0x260] sm:$0xff] %vm365_vm0, %v529_v45 }
 0x1ab   : > { %v562_v46 = vpop.trf.xlu1 }
 0x1ac   : > { %750 = vst.msk [vmem:[%s1104_s17 + $0x2e8] sm:$0xff] %vm365_vm0, %v562_v46  ;;  %v530_v47 = vpop.trf.xlu0 }
 0x1ad   : > { %734 = vst.msk [vmem:[%s1104_s17 + $0x268] sm:$0xff] %vm365_vm0, %v530_v47 }
 0x1af   : > { %v563_v48 = vpop.trf.xlu1 }
 0x1b0   : > { %751 = vst.msk [vmem:[%s1104_s17 + $0x2f0] sm:$0xff] %vm365_vm0, %v563_v48  ;;  %v531_v49 = vpop.trf.xlu0 }
 0x1b1   : > { %735 = vst.msk [vmem:[%s1104_s17 + $0x270] sm:$0xff] %vm365_vm0, %v531_v49 }
 0x1b3   : > { %v564_v50 = vpop.trf.xlu1 }
 0x1b4   : > { %752 = vst.msk [vmem:[%s1104_s17 + $0x2f8] sm:$0xff] %vm365_vm0, %v564_v50  ;;  %v532_v51 = vpop.trf.xlu0 }
 0x1b5   : > { %736 = vst.msk [vmem:[%s1104_s17 + $0x278] sm:$0xff] %vm365_vm0, %v532_v51 }
 0x1b6 PF: > { %p13_p8 = scmp.ge.s32.totalorder %s1019_s19, 4   ;;  %s1325_s9 = smov %s944_s10 }
 0x1b7   : > { %s1326_s10 = smov %s948_s11  ;;  %s1327_s11 = smov %s1045_s6 }
 0x1b8   : > { %s1328_s12 = smov %s1019_s19  ;;  %15 = sbr.rel (!%p13_p8) target bundleno = 4 (0x4), region = 76 }
 0x1bf   :  { %619 = vsyncpa [#allocation4], 1 }
 0x1c0   :  { %621 = vsyncpa [#allocation4 + $0x1], 1 }
 0x1c1   :  { %622 = vsyncpa [#allocation6], 1 }

</bundles_post_ra>
